<compile_context>
chip_gen: v7x
topology: tpu7x:2x2x1
jax: 0.10.0
libtpu: 0.0.40
codegen_flags: <defaults>
</compile_context>

<pallas_src>
import functools

import jax
import jax.numpy as jnp
from jax.experimental import pallas as pl
from jax.experimental.pallas import tpu as pltpu


_SUBLANE = {4: 8, 2: 16, 1: 32}  # sublane packing multiple per itemsize


def _cdiv(a, b):
    return -(-a // b)


def _round_up(x, m):
    return _cdiv(x, m) * m


def _seg_sum(v_f32, seg_bf16):
    """Per-segment lane sum, broadcast back to every lane of its segment.

    Computed as v @ S (S = block-diagonal ones) on the otherwise-idle MXU.
    The f32 operand is split into an exact bf16 hi/lo pair so the result has
    full f32 accuracy independent of the backend's default matmul precision.
    """
    hi = v_f32.astype(jnp.bfloat16)
    lo = (v_f32 - hi.astype(jnp.float32)).astype(jnp.bfloat16)
    return (jnp.dot(hi, seg_bf16, preferred_element_type=jnp.float32)
            + jnp.dot(lo, seg_bf16, preferred_element_type=jnp.float32))


def _affine_store(d, inv, w_ref, b_ref, o_ref):
    """(x - mu) * inv_sigma * w + b; affine part in bf16 when output is bf16."""
    if o_ref.dtype == jnp.dtype(jnp.bfloat16):
        y = (d * inv).astype(jnp.bfloat16)
        o_ref[...] = (y * w_ref[...].astype(jnp.bfloat16)
                      + b_ref[...].astype(jnp.bfloat16))
    else:
        o_ref[...] = ((d * inv) * w_ref[...].astype(jnp.float32)
                      + b_ref[...].astype(jnp.float32)).astype(o_ref.dtype)


def _ln_kernel(x_ref, w_ref, b_ref, o_ref, *, eps):
    """Plain path: one tile of (tile_rows, C) logical rows; C is the lane dim."""
    x = x_ref[...].astype(jnp.float32)
    inv_c = jnp.float32(1.0 / x.shape[-1])
    mu = jnp.sum(x, axis=-1, keepdims=True) * inv_c           # pass 1
    d = x - mu
    var = jnp.sum(d * d, axis=-1, keepdims=True) * inv_c      # pass 2 (no cancellation)
    inv = jax.lax.rsqrt(var + jnp.float32(eps))
    _affine_store(d, inv, w_ref, b_ref, o_ref)


def _ln_packed_kernel(x_ref, seg_ref, w_ref, b_ref, o_ref, *, eps, c):
    """Packed path: each kernel row holds G = L//c logical rows side-by-side
    along the lane dim (L = G*c lanes), so loads/stores are lane-dense."""
    x = x_ref[...].astype(jnp.float32)
    seg = seg_ref[...]                                        # (L, L) bf16 block-diag ones
    inv_c = jnp.float32(1.0 / c)
    mu = _seg_sum(x, seg) * inv_c                             # per-segment mean, lane-broadcast
    d = x - mu
    var = jnp.maximum(_seg_sum(d * d, seg) * inv_c, 0.0)      # two-pass variance
    inv = jax.lax.rsqrt(var + jnp.float32(eps))
    _affine_store(d, inv, w_ref, b_ref, o_ref)


def _vmem_limit_bytes():
    """Generation-aware scoped-VMEM limit: ~half of physical VMEM, capped at 64 MiB."""
    cap = 64 * 1024 * 1024
    try:
        info = pltpu.get_tpu_info()
        cap = int(getattr(info, "vmem_capacity_bytes", cap)) or cap
    except Exception:
        pass
    return max(16 * 1024 * 1024, min(64 * 1024 * 1024, cap // 2))


def _choose_tile_rows(n_rows, lanes, itemsize, budget):
    """Largest row tile fitting the VMEM budget, with an even, balanced grid-step
    count so the 'parallel' row axis splits evenly over v7x's two TensorCores."""
    sub = _SUBLANE.get(itemsize, 8)
    lane_pad = _round_up(max(lanes, 1), 128)
    # Per padded element: (in + out) x double-buffering + ~12 B of f32
    # temporaries (the in-kernel f32 upcast, (x - mu), (x - mu)^2).
    per_row = lane_pad * (4 * itemsize + 12)
    t = max(sub, min(budget // per_row, 8192))
    t -= t % sub
    t = max(t, sub)
    n_pad = _round_up(n_rows, sub)
    if n_rows >= 2 * sub:
        steps = 2 * _cdiv(n_rows, 2 * t)          # even number of grid steps
        t = _round_up(_cdiv(n_rows, steps), sub)  # balanced block size
    return max(sub, min(t, n_pad))


def withbias_layernorm(x, weight, bias, *, eps=1e-5, tile_rows=None):
    """LayerNorm over the last dim with affine weight/bias.

    Matches PyTorch WithBias_LayerNorm.forward: mu = mean(-1), sigma = var(-1,
    unbiased=False), out = (x - mu)/sqrt(sigma + 1e-5) * weight + bias.
    x: any shape (..., C); weight, bias: (C,).  `tile_rows` (optional) is the
    number of kernel rows per grid step (packed rows when the packed path runs).
    """
    orig_shape = x.shape
    C = int(orig_shape[-1])
    x2 = x.reshape(-1, C)                        # free contiguous view
    N = int(x2.shape[0])

    itemsize = jnp.dtype(x.dtype).itemsize
    sub = _SUBLANE.get(itemsize, 8)
    vmem_limit = _vmem_limit_bytes()
    budget = (vmem_limit * 3) // 4               # headroom for params / scalars

    # Lane-packing factor for small C: largest G <= 128//C with N % G == 0.
    G = 1
    if 0 < C < 128 and 128 % C == 0:
        for g in range(128 // C, 0, -1):
            if N % g == 0:
                G = g
                break
    # TODO(synk): C values that do not divide 128 (e.g. 48) still take the plain
    # (partially masked store) path; a remainder-row split could pack those too.

    compiler_params = pltpu.CompilerParams(
        dimension_semantics=("parallel",),
        vmem_limit_bytes=vmem_limit,
    )

    if G > 1:
        L = G * C
        Np = N // G
        xp = x2.reshape(Np, L)                   # free contiguous reshape
        wp = jnp.tile(weight.reshape(-1), G).reshape(1, L)
        bp = jnp.tile(bias.reshape(-1), G).reshape(1, L)
        lane = jnp.arange(L, dtype=jnp.int32)
        seg = (lane[:, None] // C == lane[None, :] // C).astype(jnp.bfloat16)

        if tile_rows is None:
            tr = _choose_tile_rows(Np, L, itemsize, budget)
        else:
            tr = max(sub, _round_up(int(tile_rows), sub))
        tr = min(tr, _round_up(Np, sub))

        out = pl.pallas_call(
            functools.partial(_ln_packed_kernel, eps=float(eps), c=C),
            out_shape=jax.ShapeDtypeStruct((Np, L), x.dtype),
            grid_spec=pltpu.PrefetchScalarGridSpec(
                num_scalar_prefetch=0,
                grid=(_cdiv(Np, tr),),
                in_specs=[
                    pl.BlockSpec((tr, L), lambda i: (i, 0)),
                    pl.BlockSpec((L, L), lambda i: (0, 0)),   # constant block: DMA'd once
                    pl.BlockSpec((1, L), lambda i: (0, 0)),
                    pl.BlockSpec((1, L), lambda i: (0, 0)),
                ],
                out_specs=pl.BlockSpec((tr, L), lambda i: (i, 0)),
            ),
            compiler_params=compiler_params,
        )(xp, seg, wp, bp)
        return out.reshape(orig_shape)

    # Plain path (C >= 128, or C does not pack evenly).
    # TODO(synk): very large C (tens of thousands) on v7x's 64 MiB VMEM would
    # want a second 'arbitrary' grid axis over C-chunks with s1/s2 accumulators.
    if tile_rows is None:
        tr = _choose_tile_rows(N, C, itemsize, budget)
    else:
        tr = max(sub, _round_up(int(tile_rows), sub))
    tr = min(tr, _round_up(N, sub))

    w2 = weight.reshape(1, C)
    b2 = bias.reshape(1, C)
    out = pl.pallas_call(
        functools.partial(_ln_kernel, eps=float(eps)),
        out_shape=jax.ShapeDtypeStruct((N, C), x.dtype),
        grid_spec=pltpu.PrefetchScalarGridSpec(
            num_scalar_prefetch=0,
            grid=(_cdiv(N, tr),),
            in_specs=[
                pl.BlockSpec((tr, C), lambda i: (i, 0)),
                pl.BlockSpec((1, C), lambda i: (0, 0)),
                pl.BlockSpec((1, C), lambda i: (0, 0)),
            ],
            out_specs=pl.BlockSpec((tr, C), lambda i: (i, 0)),
        ),
        compiler_params=compiler_params,
    )(x2, w2, b2)
    return out.reshape(orig_shape)


if __name__ == "__main__":
    key = jax.random.PRNGKey(0)

    def reference(x, w, b, eps=1e-5):
        mu = jnp.mean(x, axis=-1, keepdims=True)
        var = jnp.mean((x - mu) ** 2, axis=-1, keepdims=True)
        return (x - mu) / jnp.sqrt(var + eps) * w + b

    # Shapes consistent with the module's usage: (B, H*W, C) tokens, C = 32.
    B, HW, C = 2, 64, 32

    # Deterministic parameter init exactly as in the module's __init__:
    weight = jnp.ones((C,), dtype=jnp.float32)
    bias = jnp.zeros((C,), dtype=jnp.float32)

    k1, k2, k3, k4 = jax.random.split(key, 4)

    # 1) Packed (lane-dense) path, module-init params.
    x1 = jax.random.normal(k1, (B, HW, C), dtype=jnp.float32)
    y1 = jax.block_until_ready(withbias_layernorm(x1, weight, bias))
    assert jnp.allclose(y1, reference(x1, weight, bias), atol=3e-5, rtol=3e-5), \
        "mismatch vs reference (module init params)"

    # 2) Ragged row count (N % 4 != 0): packs with G=2 (64 lanes), partial last block.
    x2 = jax.random.normal(k2, (B, 65, C), dtype=jnp.float32)
    y2 = jax.block_until_ready(withbias_layernorm(x2, weight, bias))
    assert jnp.allclose(y2, reference(x2, weight, bias), atol=3e-5, rtol=3e-5), \
        "mismatch vs reference (ragged rows)"

    # 3) Non-trivial affine params (exercises per-segment tiled weight/bias).
    w_r = 1.0 + 0.1 * jax.random.normal(k3, (C,), dtype=jnp.float32)
    b_r = 0.1 * jax.random.normal(k4, (C,), dtype=jnp.float32)
    y3 = jax.block_until_ready(withbias_layernorm(x1, w_r, b_r))
    assert jnp.allclose(y3, reference(x1, w_r, b_r), atol=3e-5, rtol=3e-5), \
        "mismatch vs reference (random affine params)"

    # 4) Plain (unpacked) path: C = 128, no packing needed.
    x3 = jax.random.normal(k2, (4, 8, 128), dtype=jnp.float32)
    w3 = jnp.ones((128,), dtype=jnp.float32)
    b3 = jnp.zeros((128,), dtype=jnp.float32)
    y4 = jax.block_until_ready(withbias_layernorm(x3, w3, b3))
    assert jnp.allclose(y4, reference(x3, w3, b3), atol=3e-5, rtol=3e-5), \
        "mismatch vs reference (plain path, C=128)"

    # 5) bf16 input/output: packed path, bf16 affine epilogue, f32 statistics.
    x_bf = x1.astype(jnp.bfloat16)
    y5 = jax.block_until_ready(withbias_layernorm(x_bf, weight, bias))
    ref5 = reference(x_bf.astype(jnp.float32), weight, bias)
    assert jnp.allclose(y5.astype(jnp.float32), ref5, atol=3e-2, rtol=3e-2), \
        "mismatch vs reference (bf16 packed path)"

    print("KERNEL_OK")
</pallas_src>

<mosaic_0001>
module attributes {stable_mosaic.version = 11 : i64} {
  func.func @_ln_packed_kernel(%arg0: i32, %arg1: memref<16x128xf32, #tpu.memory_space<vmem>>, %arg2: memref<128x128xbf16, #tpu.memory_space<vmem>>, %arg3: memref<1x128xf32, #tpu.memory_space<vmem>>, %arg4: memref<1x128xf32, #tpu.memory_space<vmem>>, %arg5: memref<16x128xf32, #tpu.memory_space<vmem>>) attributes {dimension_semantics = [#tpu.dimension_semantics<parallel>], iteration_bounds = array<i64: 2>, scalar_prefetch = 0 : i64, scratch_operands = 0 : i64, tpu.core_type = #tpu.core_type<tc>, window_params = [{transform_indices = @transform_0, window_bounds = array<i64: 16, 128>}, {pipeline_mode = #tpu.pipeline_mode<synchronous>, transform_indices = @transform_1, window_bounds = array<i64: 128, 128>}, {pipeline_mode = #tpu.pipeline_mode<synchronous>, transform_indices = @transform_2, window_bounds = array<i64: 1, 128>}, {pipeline_mode = #tpu.pipeline_mode<synchronous>, transform_indices = @transform_3, window_bounds = array<i64: 1, 128>}, {transform_indices = @transform_4, window_bounds = array<i64: 16, 128>}]} {
    %c0 = arith.constant 0 : index
    %c0_0 = arith.constant 0 : index
    %0 = vector.load %arg1[%c0, %c0_0] : memref<16x128xf32, #tpu.memory_space<vmem>>, vector<16x128xf32>
    %c0_1 = arith.constant 0 : index
    %c0_2 = arith.constant 0 : index
    %1 = vector.load %arg2[%c0_1, %c0_2] : memref<128x128xbf16, #tpu.memory_space<vmem>>, vector<128x128xbf16>
    %2 = arith.truncf %0 : vector<16x128xf32> to vector<16x128xbf16>
    %3 = arith.extf %2 : vector<16x128xbf16> to vector<16x128xf32>
    %4 = arith.subf %0, %3 : vector<16x128xf32>
    %5 = arith.truncf %4 : vector<16x128xf32> to vector<16x128xbf16>
    %cst = arith.constant dense<0.000000e+00> : vector<16x128xf32>
    %6 = tpu.matmul %2, %1, %cst {dimension_numbers = #tpu.dot_dimension_numbers<[1], [0], [0], [1], [0, 0, 1, 1], [], []>} : vector<16x128xbf16>, vector<128x128xbf16>, vector<16x128xf32> -> vector<16x128xf32>
    %cst_3 = arith.constant dense<0.000000e+00> : vector<16x128xf32>
    %7 = tpu.matmul %5, %1, %cst_3 {dimension_numbers = #tpu.dot_dimension_numbers<[1], [0], [0], [1], [0, 0, 1, 1], [], []>} : vector<16x128xbf16>, vector<128x128xbf16>, vector<16x128xf32> -> vector<16x128xf32>
    %8 = arith.addf %6, %7 : vector<16x128xf32>
    %cst_4 = arith.constant 3.125000e-02 : f32
    %9 = vector.broadcast %cst_4 : f32 to vector<16x128xf32>
    %10 = arith.mulf %8, %9 : vector<16x128xf32>
    %11 = arith.subf %0, %10 : vector<16x128xf32>
    %12 = arith.mulf %11, %11 : vector<16x128xf32>
    %13 = arith.truncf %12 : vector<16x128xf32> to vector<16x128xbf16>
    %14 = arith.extf %13 : vector<16x128xbf16> to vector<16x128xf32>
    %15 = arith.subf %12, %14 : vector<16x128xf32>
    %16 = arith.truncf %15 : vector<16x128xf32> to vector<16x128xbf16>
    %cst_5 = arith.constant dense<0.000000e+00> : vector<16x128xf32>
    %17 = tpu.matmul %13, %1, %cst_5 {dimension_numbers = #tpu.dot_dimension_numbers<[1], [0], [0], [1], [0, 0, 1, 1], [], []>} : vector<16x128xbf16>, vector<128x128xbf16>, vector<16x128xf32> -> vector<16x128xf32>
    %cst_6 = arith.constant dense<0.000000e+00> : vector<16x128xf32>
    %18 = tpu.matmul %16, %1, %cst_6 {dimension_numbers = #tpu.dot_dimension_numbers<[1], [0], [0], [1], [0, 0, 1, 1], [], []>} : vector<16x128xbf16>, vector<128x128xbf16>, vector<16x128xf32> -> vector<16x128xf32>
    %19 = arith.addf %17, %18 : vector<16x128xf32>
    %cst_7 = arith.constant 3.125000e-02 : f32
    %20 = vector.broadcast %cst_7 : f32 to vector<16x128xf32>
    %21 = arith.mulf %19, %20 : vector<16x128xf32>
    %cst_8 = arith.constant 0.000000e+00 : f32
    %22 = vector.broadcast %cst_8 : f32 to vector<16x128xf32>
    %23 = arith.maximumf %21, %22 : vector<16x128xf32>
    %cst_9 = arith.constant 9.99999974E-6 : f32
    %24 = vector.broadcast %cst_9 : f32 to vector<16x128xf32>
    %25 = arith.addf %23, %24 : vector<16x128xf32>
    %26 = math.rsqrt %25 : vector<16x128xf32>
    %27 = arith.mulf %11, %26 : vector<16x128xf32>
    %c0_10 = arith.constant 0 : index
    %c0_11 = arith.constant 0 : index
    %28 = vector.load %arg3[%c0_10, %c0_11] : memref<1x128xf32, #tpu.memory_space<vmem>>, vector<1x128xf32>
    %29 = vector.broadcast %28 : vector<1x128xf32> to vector<16x128xf32>
    %30 = arith.mulf %27, %29 : vector<16x128xf32>
    %c0_12 = arith.constant 0 : index
    %c0_13 = arith.constant 0 : index
    %31 = vector.load %arg4[%c0_12, %c0_13] : memref<1x128xf32, #tpu.memory_space<vmem>>, vector<1x128xf32>
    %32 = vector.broadcast %31 : vector<1x128xf32> to vector<16x128xf32>
    %33 = arith.addf %30, %32 : vector<16x128xf32>
    %c0_14 = arith.constant 0 : index
    %c0_15 = arith.constant 0 : index
    %34 = vector.load %arg5[%c0_14, %c0_15] : memref<16x128xf32, #tpu.memory_space<vmem>>, vector<16x128xf32>
    tpu.vector_store %arg5[%c0_14, %c0_15], %33 {strides = array<i32>} : memref<16x128xf32, #tpu.memory_space<vmem>>, vector<16x128xf32>,
    return
  }
  func.func @transform_0(%arg0: i32) -> (i32, i32) {
    %c0_i32 = arith.constant 0 : i32
    %c0_i32_0 = arith.constant 0 : i32
    return %arg0, %c0_i32 : i32, i32
  }
  func.func @transform_1(%arg0: i32) -> (i32, i32) {
    %c0_i32 = arith.constant 0 : i32
    %c0_i32_0 = arith.constant 0 : i32
    %c0_i32_1 = arith.constant 0 : i32
    return %c0_i32, %c0_i32_0 : i32, i32
  }
  func.func @transform_2(%arg0: i32) -> (i32, i32) {
    %c0_i32 = arith.constant 0 : i32
    %c0_i32_0 = arith.constant 0 : i32
    %c0_i32_1 = arith.constant 0 : i32
    return %c0_i32, %c0_i32_0 : i32, i32
  }
  func.func @transform_3(%arg0: i32) -> (i32, i32) {
    %c0_i32 = arith.constant 0 : i32
    %c0_i32_0 = arith.constant 0 : i32
    %c0_i32_1 = arith.constant 0 : i32
    return %c0_i32, %c0_i32_0 : i32, i32
  }
  func.func @transform_4(%arg0: i32) -> (i32, i32) {
    %c0_i32 = arith.constant 0 : i32
    %c0_i32_0 = arith.constant 0 : i32
    return %arg0, %c0_i32 : i32, i32
  }
}

</mosaic_0001>

<bundles_post_ra>
// kernel: tpu_custom_call.1
= control target key start
LH: loop header
LB: loop body
LE: loop exit
PB: predicated region body
PF: predicated region fallthrough
CT: control target
= control target key end

     0   :  { %9 = vsyncpa [#allocation3], 0  ;;  %s1297_s0 = inlined_call_operand.hbm [shape: f32[32,128], index: 0, kind: input, shape index: {}]   ;;  %s1298_s1 = inlined_call_operand.hbm [shape: bf16[128,128], index: 1, kind: input, shape index: {}]   ;;  %s1299_s2 = inlined_call_operand.vmem [shape: f32[1,128], index: 2, kind: input, shape index: {}]   ;;  %s1300_s3 = inlined_call_operand.vmem [shape: f32[1,128], index: 3, kind: input, shape index: {}]   ;;  %s1301_s4 = inlined_call_operand.hbm [shape: f32[32,128], index: 4, kind: output, shape index: {}]  }
   0x1   :  { %11 = vsyncpa [#allocation3 + $0x1], 0 }
   0x2   :  { %12 = vsyncpa [#allocation6], 0 }
   0x3   :  { %13 = vsyncpa [#allocation4], 0 }
   0x4   :  { %15 = vsyncpa [#allocation4 + $0x1], 0  ;;  %s1004_s15 = smov 0   ;;  %s1006_s16 = smov 0  }
   0x5   :  { %s1008_s17 = smov 0   ;;  %s1010_s18 = smov 0  }
   0x6 LB: > { %s1025_s19 = sadd.s32 4294967295, %s966_s18   ;;  %s609_s20 = sadd.s32 4294967294, %s966_s18   ;;  %s966_s18 = sphi %s1010_s18, %s1321_s18   ;;  %s962_s17 = sphi %s1008_s17, %s1320_s17   ;;  %s958_s16 = sphi %s1006_s16, %s1319_s16   ;;  %s954_s15 = sphi %s1004_s15, %s1318_s15  }
   0x7   : > { %p41_p0 = scmp.ne.s32.totalorder %s958_s16, %s954_s15  ;;  %p1302_p1 = scmp.eq.s32.totalorder %s1025_s19, 0 }
   0x8   : > { %p134_p3 = scmp.eq.s32.totalorder %s609_s20, 1  ;;  %p610_p5 = scmp.ge.s32.totalorder %s966_s18, 1 }
   0x9   : > { %p1034_p4 = por %p1302_p1, %p41_p0  ;;  %p141_p7 = scmp.lt.s32.totalorder %s966_s18, 3 }
   0xa   : > { %p1039_p6 = por %p134_p3, %p41_p0  ;;  %s968_s24 = smov [#allocation5]  }
   0xb   : > { %s1305_s21 = scalar_select %p1034_p4, 1, 0 }
   0xc   : > { %s1306_s22 = scalar_select %p1039_p6, 1, 0 }
   0xd   : > { %p1044_p8 = pnand %p610_p5, %p141_p7  ;;  %s153_s25 = sshll.u32 %s968_s24, 4  ;;  %s1048_s25 = int_to_ptr.vmem [resolvable:$true] %s153_s25 }
   0xe   : > { %s1060_s27 = sadd.s32 1, %s966_s18   ;;  %s28_s28 = sadd.s32 1, %s962_s17 }
   0xf   : > { %s1307_s23 = scalar_select %p1044_p8, 1, 0 }
  0x10   : > { %p769_p9 = pneg %p1044_p8  ;;  %s25_s29 = ssub.s32 %s966_s18, %s1060_s27 }
  0x11   : > { %s838_s6 = scalar_lea.hbm %s1298_s1, 1024 }
  0x12   : > { %p1055_p11 = pnand %p769_p9, %p1302_p1  ;;  %p839_p12 = scmp.ne.s32.totalorder %s1298_s1, %s838_s6 }
  0x13   : > { %p845_p5 = scmp.lt.u32.totalorder %s838_s6, %s1298_s1 }
  0x14   : > { %p840_p13 = pneg %p1055_p11 }
  0x16   : > { %p841_p0 = pnand %p840_p13, %p839_p12 }
  0x18   : > { %p842_p3 = pneg %p841_p0 }
  0x1a   : > { %p847_p7 = pnand %p845_p5, %p842_p3 }
  0x1c   : > { %850 = shalt.err (!%p847_p7)
}
  0x1d   : > { %s851_s11 = scalar_lea.vmem %s1048_s25, 1024  ;;  %p859_p2 = scmp.lt.s32.totalorder %s1048_s25, %s1048_s25 }
  0x1e   : > { %p852_p9 = scmp.ne.s32.totalorder %s1048_s25, %s851_s11  ;;  %p860_p6 = scmp.lt.s32.totalorder %s851_s11, %s851_s11 }
  0x20   : > { %p854_p10 = pnand %p852_p9, %p840_p13  ;;  %p861_p4 = por %p860_p6, %p859_p2 }
  0x22   : > { %p855_p1 = pneg %p854_p10 }
  0x24   : > { %p862_p8 = pnand %p861_p4, %p855_p1 }
  0x26   : > { %865 = shalt.err (!%p862_p8)
}
  0x27   : > { %s969_s12 = smov 64   ;;  %s970_s13 = smov 4  }
  0x28   : > { %772 = dma.hbm_to_vmem [thread:$0]  (!%p1055_p11), %s1298_s1, 1024, %s1048_s25, [#allocation6], %s969_s12, %s969_s12, %s970_s13  }
  0x29   : > { %p26_p2 = scmp.eq.s32.totalorder %s25_s29, 0  ;;  %p35_p1 = scmp.ne.s32.totalorder %s962_s17, %s958_s16 }
  0x2a   : > { %p36_p4 = scmp.eq.s32.totalorder %s966_s18, 0  ;;  %p782_p6 = scmp.lt.s32.totalorder %s966_s18, 2 }
  0x2b   : > { %s1091_s24 = scalar_select %p26_p2, %s962_s17, %s28_s28  }
  0x2c   : > { %p37_p8 = por %p36_p4, %p35_p1  ;;  %p1309_p10 = scmp.eq.s32.totalorder %s1025_s19, 1 }
  0x2d   : > { %s173_s5 = sand.u32 1, %s962_s17   ;;  %s635_s6 = sshll.u32 %s966_s18, 8 }
  0x2e   : > { %p1095_p12 = por %p1309_p10, %p35_p1  ;;  %s613_s7 = sshll.u32 %s173_s5, 4 }
  0x2f   : > { %s1104_s9 = scalar_lea.hbm %s1297_s0, %s635_s6  ;;  %s177_s25 = scalar_lea.vmem [#allocation2], %s613_s7 }
  0x30   : > { %s184_s28 = sshll.u32 %s177_s25, 4  ;;  %p1106_p11 = pnand %p782_p6, %p37_p8  ;;  %s1110_s28 = int_to_ptr.vmem [resolvable:$true] %s184_s28 }
  0x31   : > { %s1112_s10 = scalar_lea.sflag [#allocation3], %s173_s5  ;;  %s866_s11 = scalar_lea.hbm %s1104_s9, 256 }
  0x32   : > { %p867_p13 = scmp.ne.s32.totalorder %s1104_s9, %s866_s11  ;;  %p868_p0 = pneg %p1106_p11 }
  0x33   : > { %s871_s14 = scalar_lea.hbm %s1297_s0, 512  ;;  %p872_p7 = scmp.lt.u32.totalorder %s1104_s9, %s1297_s0 }
  0x34   : > { %p869_p3 = pnand %p868_p0, %p867_p13  ;;  %p873_p9 = scmp.lt.u32.totalorder %s871_s14, %s866_s11 }
  0x35   : > { %p875_p1 = scmp.lt.u32.totalorder %s866_s11, %s1104_s9 }
  0x36   : > { %p870_p5 = pneg %p869_p3  ;;  %p874_p2 = por %p873_p9, %p872_p7 }
  0x38   : > { %p876_p4 = por %p875_p1, %p874_p2 }
  0x3a   : > { %p877_p6 = pnand %p876_p4, %p870_p5 }
  0x3c   : > { %880 = shalt.err (!%p877_p6)
}
  0x3d   : > { %s881_s5 = scalar_lea.vmem %s1110_s28, 256  ;;  %s971_s7 = smov [#allocation2]  }
  0x3e   : > { %p882_p8 = scmp.ne.s32.totalorder %s1110_s28, %s881_s5  ;;  %s886_s26 = sshll.u32 %s971_s7, 4  ;;  %s887_s26 = int_to_ptr.vmem [resolvable:$false] %s886_s26 }
  0x3f   : > { %s888_s8 = scalar_lea.vmem %s887_s26, 512  ;;  %p889_p3 = scmp.lt.s32.totalorder %s1110_s28, %s887_s26 }
  0x40   : > { %p884_p10 = pnand %p882_p8, %p868_p0  ;;  %p890_p7 = scmp.lt.s32.totalorder %s888_s8, %s881_s5 }
  0x42   : > { %p885_p13 = pneg %p884_p10  ;;  %p891_p9 = por %p890_p7, %p889_p3 }
  0x44   : > { %p892_p2 = pnand %p891_p9, %p885_p13 }
  0x46   : > { %895 = shalt.err (!%p892_p2)
}
  0x47   : > { %s972_s25 = smov 128   ;;  %s973_s11 = smov 8  }
  0x48   : > { %776 = dma.hbm_to_vmem [thread:$0]  (!%p1106_p11), %s1104_s9, 256, %s1110_s28, %s1112_s10, %s972_s25, %s972_s25, %s973_s11  }
  0x49   : > { %p1312_p0 = scmp.ne.s32.totalorder %s1307_s23, 0 }
  0x4a   : > { %s1143_s12 = sand.u32 (!%p1312_p0), 1, %s958_s16   ;;  %p1313_p5 = scmp.ne.s32.totalorder (!%p1312_p0), %s1305_s21, 0 }
  0x4b   : > { %196 = sbr.rel (%p1312_p0) target bundleno = 664 (0x298), region = 36  ;;  %s617_s13 = sshll.u32 (!%p1312_p0), %s1143_s12, 4 }
  0x4c   : > { %s199_s14 = scalar_lea.sflag (!%p1312_p0), [#allocation3], %s1143_s12  ;;  %s202_s20 = scalar_lea.vmem (!%p1312_p0), [#allocation2], %s617_s13 }
  0x52   : > { %941 = dma.done.wait (%p1313_p5), %s199_s14, 256  }
  0x53   : > { %943 = vsyncadd (%p1313_p5), %s199_s14, 4294967040  ;;  %p1314_p11 = scmp.eq.s32.totalorder %s1025_s19, 0 }
  0x55   : > { %945 = dma.done.wait (%p1314_p11), [#allocation6], 1024   ;;  %p1315_p1 = pmov %p1314_p11 }
  0x56   : > { %v974_v0 = vmov 0.0   ;;  %vm975_vm0 = vmmov 0   ;;  %v1163_v1 = vld [vmem:[#allocation5] sm:$0xff]   ;;  %v1166_v2 = vld [vmem:[#allocation5 + $0x8] sm:$0xff]   ;;  %v1172_v3 = vld [vmem:[#allocation5 + $0x10] sm:$0xff]   ;;  %s636_s29 = sshll.u32 %s1025_s19, 8 }
  0x57   : > { %947 = vsyncadd (%p1315_p1), [#allocation6], 4294966272  ;;  %673 = vmatprep.subr.bf16.mxu0 %v974_v0  ;;  %689 = vmatprep.mubr.msk.bf16.mxu0 %vm975_vm0, %v974_v0  ;;  %v1178_v4 = vld [vmem:[#allocation5 + $0x18] sm:$0xff]   ;;  %v1184_v5 = vld [vmem:[#allocation5 + $0x20] sm:$0xff]   ;;  %s230_s10 = scalar_lea.vmem [#allocation7], %s617_s13  ;;  %s1251_s26 = scalar_lea.hbm %s1301_s4, %s636_s29 }
  0x58   : > { %713 = vmatprep.subr.bf16.mxu1 %v974_v0  ;;  %729 = vmatprep.mubr.msk.bf16.mxu1 %vm975_vm0, %v974_v0  ;;  %v234_v6 = vld [vmem:[%s202_s20] sm:$0xff]  ;;  %v235_v7 = vld [vmem:[%s202_s20 + $0x8] sm:$0xff]  ;;  %s526_s6 = sshll.u32 %s230_s10, 4  ;;  %s513_s8 = scalar_lea.sflag [#allocation4], %s1143_s12  ;;  %s1253_s6 = int_to_ptr.vmem [resolvable:$true] %s526_s6 }
  0x59   : > { %674 = vmatpush3.bf16.msra.mxu0 %v1163_v1  ;;  %714 = vmatpush3.bf16.msra.mxu1 %v1163_v1  ;;  %v252_v8 = vpack.c.bf16 %v235_v7, %v234_v6  ;;  %v1190_v9 = vld [vmem:[#allocation5 + $0x28] sm:$0xff]   ;;  %v1196_v12 = vld [vmem:[#allocation5 + $0x30] sm:$0xff]   ;;  %v833_v15 = vld [vmem:[#allocation5 + $0x38] sm:$0xff]   ;;  %s896_s19 = scalar_lea.vmem %s1253_s6, 256  ;;  %s976_s25 = smov [#allocation7]  }
  0x5a   : > { %675 = vmatprep.subr.bf16.mxu0 %v974_v0  ;;  %715 = vmatprep.subr.bf16.mxu1 %v974_v0  ;;  %v628_v44 = vld [vmem:[%s1299_s2] ss:$0 sm:$0xff]  ;;  %p897_p4 = scmp.ne.s32.totalorder %s1253_s6, %s896_s19  ;;  %s900_s11 = sshll.u32 %s976_s25, 4  ;;  %s901_s11 = int_to_ptr.vmem [resolvable:$false] %s900_s11 }
  0x5b   : > { %v253_v10 = vunpack.c.l.bf16 %v252_v8  ;;  %v254_v11 = vunpack.c.h.bf16 %v252_v8  ;;  %v629_v47 = vld [vmem:[%s1300_s3] ss:$0 sm:$0xff]  ;;  %s902_s13 = scalar_lea.vmem %s901_s11, 512  ;;  %p903_p10 = scmp.lt.s32.totalorder %s1253_s6, %s901_s11 }
  0x5c   : > { %p898_p6 = pnand %p897_p4, %p1095_p12  ;;  %p904_p13 = scmp.lt.s32.totalorder %s902_s13, %s896_s19 }
  0x5d   : > { %676 = vmatpush3.bf16.msra.mxu0 %v1166_v2  ;;  %716 = vmatpush3.bf16.msra.mxu1 %v1166_v2  ;;  %v255_v13 = vsub.f32 %v234_v6, %v253_v10  ;;  %v256_v14 = vsub.f32 %v235_v7, %v254_v11 }
  0x5e   : > { %677 = vmatprep.subr.bf16.mxu0 %v974_v0  ;;  %717 = vmatprep.subr.bf16.mxu1 %v974_v0  ;;  %p899_p8 = pneg %p898_p6  ;;  %p905_p3 = por %p904_p13, %p903_p10 }
  0x5f   : > { %v257_v16 = vpack.c.bf16 %v256_v14, %v255_v13 }
  0x60   : > { %p906_p7 = pnand %p905_p3, %p899_p8 }
  0x61   : > { %678 = vmatpush3.bf16.msra.mxu0 %v1172_v3  ;;  %718 = vmatpush3.bf16.msra.mxu1 %v1172_v3 }
  0x62   : > { %679 = vmatprep.subr.bf16.mxu0 %v974_v0  ;;  %719 = vmatprep.subr.bf16.mxu1 %v974_v0 }
  0x65   : > { %680 = vmatpush3.bf16.msra.mxu0 %v1178_v4  ;;  %720 = vmatpush3.bf16.msra.mxu1 %v1178_v4 }
  0x66   : > { %681 = vmatprep.subr.bf16.mxu0 %v974_v0  ;;  %721 = vmatprep.subr.bf16.mxu1 %v974_v0 }
  0x69   : > { %682 = vmatpush3.bf16.msra.mxu0 %v1184_v5  ;;  %722 = vmatpush3.bf16.msra.mxu1 %v1184_v5 }
  0x6a   : > { %683 = vmatprep.subr.bf16.mxu0 %v974_v0  ;;  %723 = vmatprep.subr.bf16.mxu1 %v974_v0 }
  0x6d   : > { %684 = vmatpush3.bf16.msra.mxu0 %v1190_v9  ;;  %724 = vmatpush3.bf16.msra.mxu1 %v1190_v9 }
  0x6e   : > { %685 = vmatprep.subr.bf16.mxu0 %v974_v0  ;;  %725 = vmatprep.subr.bf16.mxu1 %v974_v0 }
  0x71   : > { %686 = vmatpush3.bf16.msra.mxu0 %v1196_v12  ;;  %726 = vmatpush3.bf16.msra.mxu1 %v1196_v12 }
  0x72   : > { %687 = vmatprep.subr.bf16.mxu0 %v974_v0  ;;  %727 = vmatprep.subr.bf16.mxu1 %v974_v0 }
  0x75   : > { %688 = vmatpush3.bf16.msra.mxu0 %v833_v15  ;;  %728 = vmatpush3.bf16.msra.mxu1 %v833_v15 }
  0x76   : > { %693 = vmatprep.subr.bf16.mxu0 %v974_v0  ;;  %733 = vmatprep.subr.bf16.mxu1 %v974_v0 }
  0x78   : > { %690 = vmatmul.mubr.bf16.vlgmr.msra.gmra.mrb[0].mxu0 %v257_v16 }
  0x79   : > { %694 = vmatpush3.bf16.msra.mxu0 %v1163_v1  ;;  %709 = vmatprep.mubr.msk.bf16.mxu0 %vm975_vm0, %v974_v0 }
  0x7a   : > { %695 = vmatprep.subr.bf16.mxu0 %v974_v0 }
  0x7d   : > { %696 = vmatpush3.bf16.msra.mxu0 %v1166_v2 }
  0x7e   : > { %697 = vmatprep.subr.bf16.mxu0 %v974_v0 }
  0x81   : > { %698 = vmatpush3.bf16.msra.mxu0 %v1172_v3 }
  0x82   : > { %699 = vmatprep.subr.bf16.mxu0 %v974_v0 }
  0x85   : > { %700 = vmatpush3.bf16.msra.mxu0 %v1178_v4 }
  0x86   : > { %701 = vmatprep.subr.bf16.mxu0 %v974_v0 }
  0x89   : > { %702 = vmatpush3.bf16.msra.mxu0 %v1184_v5 }
  0x8a   : > { %703 = vmatprep.subr.bf16.mxu0 %v974_v0 }
  0x8d   : > { %704 = vmatpush3.bf16.msra.mxu0 %v1190_v9 }
  0x8e   : > { %705 = vmatprep.subr.bf16.mxu0 %v974_v0 }
  0x91   : > { %706 = vmatpush3.bf16.msra.mxu0 %v1196_v12 }
  0x92   : > { %707 = vmatprep.subr.bf16.mxu0 %v974_v0 }
  0x95   : > { %708 = vmatpush3.bf16.msra.mxu0 %v833_v15 }
  0x98   : > { %710 = vmatmul.mubr.bf16.vlgmr.msra.gmra.mrb[0].mxu0 %v252_v8 }
 0x16b   : > { %v381_v17 = vpop.f32.mrb[0].mxu0 }
 0x16c   : > { %v388_v18 = vmul.f32 0.03125, %v381_v17  ;;  %v711_v19 = vpop.f32.mrb[1].mxu0 }
 0x16d   : > { %v384_v20 = vpop.f32.mrb[2].mxu0 }
 0x16e   : > { %v390_v21 = vsub.f32 %v234_v6, %v388_v18  ;;  %v389_v22 = vmul.f32 0.03125, %v384_v20  ;;  %v712_v23 = vpop.f32.mrb[3].mxu0 }
 0x170   : > { %v391_v24 = vsub.f32 %v235_v7, %v389_v22  ;;  %v392_v25 = vmul.f32 %v390_v21, %v390_v21 }
 0x172   : > { %v393_v26 = vmul.f32 %v391_v24, %v391_v24 }
 0x174   : > { %v394_v27 = vpack.c.bf16 %v393_v26, %v392_v25 }
 0x176   : > { %v395_v28 = vunpack.c.l.bf16 %v394_v27  ;;  %v396_v29 = vunpack.c.h.bf16 %v394_v27 }
 0x178   : > { %v397_v30 = vsub.f32 %v392_v25, %v395_v28  ;;  %v398_v31 = vsub.f32 %v393_v26, %v396_v29 }
 0x17a   : > { %v399_v32 = vpack.c.bf16 %v398_v31, %v397_v30 }
 0x17c   : > { %730 = vmatmul.mubr.bf16.vlgmr.msra.gmra.mrb[0].mxu1 %v399_v32 }
 0x17d   : > { %734 = vmatpush3.bf16.msra.mxu1 %v1163_v1  ;;  %749 = vmatprep.mubr.msk.bf16.mxu1 %vm975_vm0, %v974_v0 }
 0x17e   : > { %735 = vmatprep.subr.bf16.mxu1 %v974_v0 }
 0x181   : > { %736 = vmatpush3.bf16.msra.mxu1 %v1166_v2 }
 0x182   : > { %737 = vmatprep.subr.bf16.mxu1 %v974_v0 }
 0x185   : > { %738 = vmatpush3.bf16.msra.mxu1 %v1172_v3 }
 0x186   : > { %739 = vmatprep.subr.bf16.mxu1 %v974_v0 }
 0x189   : > { %740 = vmatpush3.bf16.msra.mxu1 %v1178_v4 }
 0x18a   : > { %741 = vmatprep.subr.bf16.mxu1 %v974_v0 }
 0x18d   : > { %742 = vmatpush3.bf16.msra.mxu1 %v1184_v5 }
 0x18e   : > { %743 = vmatprep.subr.bf16.mxu1 %v974_v0 }
 0x191   : > { %744 = vmatpush3.bf16.msra.mxu1 %v1190_v9 }
 0x192   : > { %745 = vmatprep.subr.bf16.mxu1 %v974_v0 }
 0x195   : > { %746 = vmatpush3.bf16.msra.mxu1 %v1196_v12 }
 0x196   : > { %747 = vmatprep.subr.bf16.mxu1 %v974_v0 }
 0x199   : > { %748 = vmatpush3.bf16.msra.mxu1 %v833_v15 }
 0x19c   : > { %750 = vmatmul.mubr.bf16.vlgmr.msra.gmra.mrb[0].mxu1 %v394_v27 }
 0x26f   : > { %v475_v33 = vpop.f32.mrb[0].mxu1 }
 0x270   : > { %v482_v34 = vmul.f32 0.03125, %v475_v33  ;;  %v751_v35 = vpop.f32.mrb[1].mxu1 }
 0x271   : > { %v478_v36 = vpop.f32.mrb[2].mxu1 }
 0x272   : > { %v484_v37 = vmax.f32 %v482_v34, 0.0  ;;  %v483_v38 = vmul.f32 0.03125, %v478_v36  ;;  %v752_v39 = vpop.f32.mrb[3].mxu1 }
 0x274   : > { %v486_v40 = vadd.f32 1e-05, %v484_v37  ;;  %v485_v41 = vmax.f32 %v483_v38, 0.0 }
 0x276   : > { %834 = vrsqrt.f32 %v486_v40  ;;  %v487_v42 = vadd.f32 1e-05, %v485_v41 }
 0x278   : > { %836 = vrsqrt.f32 %v487_v42 }
 0x280   : > { %v835_v43 = vpop.eup %834 }
 0x281   : > { %v490_v45 = vmul.f32 %v835_v43, %v390_v21 }
 0x282   : > { %v837_v46 = vpop.eup %836 }
 0x283   : > { %v499_v48 = vmul.f32 %v628_v44, %v490_v45  ;;  %v491_v49 = vmul.f32 %v837_v46, %v391_v24 }
 0x285   : > { %v508_v50 = vadd.f32 %v629_v47, %v499_v48  ;;  %v500_v51 = vmul.f32 %v628_v44, %v491_v49 }
 0x287   : > { %v509_v52 = vadd.f32 %v629_v47, %v500_v51  ;;  %510 = vst [vmem:[%s230_s10] sm:$0xff] %v508_v50 }
 0x289   : > { %511 = vst [vmem:[%s230_s10 + $0x8] sm:$0xff] %v509_v52 }
 0x28a   : > { %909 = shalt.err (!%p906_p7)
}
 0x28b   : > { %s910_s14 = scalar_lea.hbm %s1251_s26, 256  ;;  %s914_s23 = scalar_lea.hbm %s1301_s4, 512 }
 0x28c   : > { %p911_p9 = scmp.ne.s32.totalorder %s1251_s26, %s910_s14  ;;  %p915_p5 = scmp.lt.u32.totalorder %s1251_s26, %s1301_s4 }
 0x28d   : > { %p916_p11 = scmp.lt.u32.totalorder %s914_s23, %s910_s14  ;;  %p918_p4 = scmp.lt.u32.totalorder %s910_s14, %s1251_s26 }
 0x28e   : > { %p912_p2 = pnand %p911_p9, %p1095_p12 }
 0x28f   : > { %p917_p1 = por %p916_p11, %p915_p5 }
 0x290   : > { %p913_p0 = pneg %p912_p2 }
 0x291   : > { %p919_p6 = por %p918_p4, %p917_p1 }
 0x293   : > { %p920_p8 = pnand %p919_p6, %p913_p0 }
 0x295   : > { %923 = shalt.err (!%p920_p8)
}
 0x296   : > { %s977_s29 = smov 128   ;;  %s978_s10 = smov 8  }
 0x297   : > { %767 = dma.vmem_to_hbm [thread:$0]  (%p1095_p12), %s1253_s6, 256, %s1251_s26, %s513_s8, %s977_s29, %s977_s29, %s978_s10  }
 0x298 PF: > { %s541_s5 = sand.u32 1, %s954_s15   ;;  %p1316_p10 = scmp.ne.s32.totalorder %s1306_s22, 0 }
 0x299   : > { %p1317_p13 = scmp.ge.s32.totalorder %s966_s18, 2  ;;  %s542_s7 = scalar_lea.sflag [#allocation4], %s541_s5 }
 0x29b   : > { %p778_p3 = pnand %p1317_p13, %p1316_p10 }
 0x29d   : > { %949 = dma.done.wait (!%p778_p3), %s542_s7, 256  }
 0x29e   : > { %951 = vsyncadd (!%p778_p3), %s542_s7, 4294967040  ;;  %p18_p7 = scmp.ge.s32.totalorder %s1060_s27, 4   ;;  %s1318_s15 = smov %s958_s16 }
 0x29f   : > { %s1319_s16 = smov %s962_s17  ;;  %s1320_s17 = smov %s1091_s24 }
 0x2a0   : > { %s1321_s18 = smov %s1060_s27  ;;  %20 = sbr.rel (!%p18_p7) target bundleno = 6 (0x6), region = 85 }
 0x2a7   :  { %547 = vsyncpa [#allocation3], 1 }
 0x2a8   :  { %549 = vsyncpa [#allocation3 + $0x1], 1 }
 0x2a9   :  { %550 = vsyncpa [#allocation6], 1 }
 0x2aa   :  { %551 = vsyncpa [#allocation4], 1 }
 0x2ab   :  { %553 = vsyncpa [#allocation4 + $0x1], 1 }

</bundles_post_ra>
